<compile_context>
chip_gen: v7x
topology: tpu7x:2x2x1
jax: 0.10.0
libtpu: 0.0.40
codegen_flags: <defaults>
</compile_context>

<pallas_src>
import functools

import jax
import jax.numpy as jnp
from jax.experimental import pallas as pl
from jax.experimental.pallas import tpu as pltpu


def _round_up(v, m):
    return ((v + m - 1) // m) * m


def _la_kl_kernel(x_ref, m_ref, t_ref, o_ref, *, n_rows, tn, mask_rows):
    pid = pl.program_id(0)

    # Cast after the DMA: compute in f32 (v5e has no bf16 VPU/EUP; safe everywhere).
    x = x_ref[...].astype(jnp.float32)   # (tn, C) logits tile
    m = m_ref[...].astype(jnp.float32)   # (1,  C) margins
    t = t_ref[...].astype(jnp.float32)   # (tn, C) soft targets tile

    if mask_rows:
        # Last tile may extend past the batch; neutralize out-of-bounds rows so
        # garbage in the pipeline buffer cannot poison the partial sum.
        row_ids = jax.lax.broadcasted_iota(jnp.int32, x.shape, 0) + pid * tn
        valid = row_ids < n_rows
        x = jnp.where(valid, x, 0.0)
        t = jnp.where(valid, t, 0.0)

    # Logit adjustment + numerically stable logsumexp along the class (lane) axis.
    xm = x + m
    z = xm - jnp.max(xm, axis=1, keepdims=True)
    lse = jnp.log(jnp.sum(jnp.exp(z), axis=1, keepdims=True))           # (tn, 1)

    # F.kl_div per row: sum_c t*(log t - logp), logp = z - lse
    #   = sum_c t*(log(safe_t) - z) + lse * sum_c t
    # Exact without assuming rows sum to 1; terms with t == 0 contribute exactly 0
    # because safe_t is tiny-but-finite and z is finite.
    safe_t = jnp.maximum(t, jnp.float32(1e-30))
    per_row = (jnp.sum(t * (jnp.log(safe_t) - z), axis=1, keepdims=True)
               + lse * jnp.sum(t, axis=1, keepdims=True))               # (tn, 1)

    # Lane-dense, unmasked store of this tile's partial sum (no carried state ->
    # the batch grid axis stays "parallel" / megacore-shardable).
    partial = jnp.sum(per_row)
    o_ref[...] = jnp.broadcast_to(partial, o_ref.shape).astype(jnp.float32)


def logit_adjust_soft(x, labels_update, cls_num_list, tau=1.0,
                      *, vmem_tile_budget_bytes=8 * 1024 * 1024):
    """x: (N, C) logits, labels_update: (N, C) soft targets, cls_num_list: (C,) counts."""
    x = jnp.asarray(x)                       # keep native dtype (bf16 stays bf16)
    labels_update = jnp.asarray(labels_update)
    N, C = x.shape
    assert labels_update.shape == (N, C)

    cls_num = jnp.asarray(cls_num_list, jnp.float32)
    m_list = (tau * jnp.log(cls_num / jnp.sum(cls_num))).reshape(1, C)  # (1, C) f32

    # ---- batch tile: multiple of 8 sublanes, VMEM-budgeted, capped at 2048 rows ----
    cp = _round_up(C, 128)                   # lane footprint of one row in VMEM
    in_bytes_per_row = cp * (jnp.dtype(x.dtype).itemsize
                             + jnp.dtype(labels_update.dtype).itemsize)
    budget_rows = (vmem_tile_budget_bytes // (2 * in_bytes_per_row)) // 8 * 8
    tn = int(max(8, min(2048, budget_rows, _round_up(N, 8))))
    num_tiles = pl.cdiv(N, tn)
    # TODO(synk): for very large C (tens of thousands of classes) add a class-axis
    # grid dimension with an online logsumexp instead of a full-extent class block.

    # Explicit scoped-VMEM limit (v5e default is only 16 MiB): double-buffered
    # inputs + generous headroom for in-kernel f32 intermediates.
    need = 2 * 2 * tn * cp * 4 + 2 * 4 * cp + num_tiles * 128 * 4
    vmem_limit = int(min(64 * 1024 * 1024,
                         max(32 * 1024 * 1024, need + 16 * 1024 * 1024)))

    kernel = functools.partial(_la_kl_kernel, n_rows=N, tn=tn,
                               mask_rows=(N % tn != 0))

    bytes_in = N * C * (jnp.dtype(x.dtype).itemsize
                        + jnp.dtype(labels_update.dtype).itemsize)
    cost = pl.CostEstimate(flops=8 * N * C,
                           transcendentals=2 * N * C,
                           bytes_accessed=bytes_in + 4 * C + num_tiles * 128 * 4)

    partials = pl.pallas_call(
        kernel,
        out_shape=jax.ShapeDtypeStruct((num_tiles, 1, 128), jnp.float32),
        grid=(num_tiles,),
        in_specs=[
            pl.BlockSpec((tn, C), lambda i: (i, 0)),   # logits tile
            pl.BlockSpec((1, C), lambda i: (0, 0)),    # m_list, resident across grid
            pl.BlockSpec((tn, C), lambda i: (i, 0)),   # soft-label tile
        ],
        out_specs=pl.BlockSpec((1, 1, 128), lambda i: (i, 0, 0)),
        compiler_params=pltpu.CompilerParams(
            dimension_semantics=("parallel",),          # no carried state
            vmem_limit_bytes=vmem_limit),
        cost_estimate=cost,
    )(x, m_list, labels_update)

    # Tiny final reduction (num_tiles elements) + batchmean normalization.
    return jnp.sum(partials[:, 0, 0]) / N


if __name__ == "__main__":
    key = jax.random.PRNGKey(0)
    N, C = 12, 10  # deliberately unaligned: exercises row masking + ragged lane dim

    # deterministic "long-tailed" class-count list (the module's only parameter source)
    cls_num_list = [float(2 ** (i % 6) * 10 + i) for i in range(C)]
    tau = 1.0

    kx, kt = jax.random.split(key)
    x = jax.random.normal(kx, (N, C), dtype=jnp.float32)
    # soft labels: rows are probability distributions
    labels_update = jax.nn.softmax(
        jax.random.normal(kt, (N, C), dtype=jnp.float32), axis=1)

    loss = logit_adjust_soft(x, labels_update, cls_num_list, tau=tau)
    jax.block_until_ready(loss)

    # pure-JAX reference check
    cls_num = jnp.asarray(cls_num_list, jnp.float32)
    m = tau * jnp.log(cls_num / jnp.sum(cls_num)).reshape(1, -1)
    logp_ref = jax.nn.log_softmax(x + m, axis=1)
    safe_t = jnp.where(labels_update > 0, labels_update, 1.0)
    ref = jnp.sum(labels_update * (jnp.log(safe_t) - logp_ref)) / N

    assert jnp.allclose(loss, ref, rtol=1e-5, atol=1e-5), (loss, ref)
    print("KERNEL_OK")
</pallas_src>

<mosaic_0001>
module attributes {stable_mosaic.version = 11 : i64} {
  func.func @_la_kl_kernel(%arg0: i32, %arg1: memref<16x10xf32, #tpu.memory_space<vmem>>, %arg2: memref<1x10xf32, #tpu.memory_space<vmem>>, %arg3: memref<16x10xf32, #tpu.memory_space<vmem>>, %arg4: memref<1x1x128xf32, #tpu.memory_space<vmem>>) attributes {dimension_semantics = [#tpu.dimension_semantics<parallel>], iteration_bounds = array<i64: 1>, scalar_prefetch = 0 : i64, scratch_operands = 0 : i64, tpu.core_type = #tpu.core_type<tc>, window_params = [{transform_indices = @transform_0, window_bounds = array<i64: 16, 10>}, {pipeline_mode = #tpu.pipeline_mode<synchronous>, transform_indices = @transform_1, window_bounds = array<i64: 1, 10>}, {transform_indices = @transform_2, window_bounds = array<i64: 16, 10>}, {transform_indices = @transform_3, window_bounds = array<i64: 1, 1, 128>}]} {
    %c0 = arith.constant 0 : index
    %c0_0 = arith.constant 0 : index
    %0 = vector.load %arg1[%c0, %c0_0] : memref<16x10xf32, #tpu.memory_space<vmem>>, vector<16x10xf32>
    %c0_1 = arith.constant 0 : index
    %c0_2 = arith.constant 0 : index
    %1 = vector.load %arg2[%c0_1, %c0_2] : memref<1x10xf32, #tpu.memory_space<vmem>>, vector<1x10xf32>
    %c0_3 = arith.constant 0 : index
    %c0_4 = arith.constant 0 : index
    %2 = vector.load %arg3[%c0_3, %c0_4] : memref<16x10xf32, #tpu.memory_space<vmem>>, vector<16x10xf32>
    %3 = tpu.iota {dimensions = array<i32: 0>} : vector<16x10xi32>
    %c16_i32 = arith.constant 16 : i32
    %4 = arith.muli %arg0, %c16_i32 : i32
    %5 = vector.broadcast %4 : i32 to vector<16x10xi32>
    %6 = arith.addi %3, %5 : vector<16x10xi32>
    %c12_i32 = arith.constant 12 : i32
    %7 = vector.broadcast %c12_i32 : i32 to vector<16x10xi32>
    %8 = arith.cmpi slt, %6, %7 : vector<16x10xi32>
    %cst = arith.constant 0.000000e+00 : f32
    %9 = vector.broadcast %cst : f32 to vector<16x10xf32>
    %10 = arith.select %8, %0, %9 : vector<16x10xi1>, vector<16x10xf32>
    %cst_5 = arith.constant 0.000000e+00 : f32
    %11 = vector.broadcast %cst_5 : f32 to vector<16x10xf32>
    %12 = arith.select %8, %2, %11 : vector<16x10xi1>, vector<16x10xf32>
    %13 = vector.broadcast %1 : vector<1x10xf32> to vector<16x10xf32>
    %14 = arith.addf %10, %13 : vector<16x10xf32>
    %cst_6 = arith.constant dense<0xFF800000> : vector<16xf32>
    %15 = vector.multi_reduction <maximumf>, %14, %cst_6 [1] : vector<16x10xf32> to vector<16xf32>
    %16 = vector.shape_cast %15 : vector<16xf32> to vector<16x1xf32>
    %17 = vector.broadcast %16 : vector<16x1xf32> to vector<16x10xf32>
    %18 = arith.subf %14, %17 : vector<16x10xf32>
    %19 = math.exp %18 : vector<16x10xf32>
    %cst_7 = arith.constant dense<0.000000e+00> : vector<16xf32>
    %20 = vector.multi_reduction <add>, %19, %cst_7 [1] : vector<16x10xf32> to vector<16xf32>
    %21 = vector.shape_cast %20 : vector<16xf32> to vector<16x1xf32>
    %22 = math.log %21 : vector<16x1xf32>
    %cst_8 = arith.constant 1.000000e-30 : f32
    %23 = vector.broadcast %cst_8 : f32 to vector<16x10xf32>
    %24 = arith.maximumf %12, %23 : vector<16x10xf32>
    %25 = math.log %24 : vector<16x10xf32>
    %26 = arith.subf %25, %18 : vector<16x10xf32>
    %27 = arith.mulf %12, %26 : vector<16x10xf32>
    %cst_9 = arith.constant dense<0.000000e+00> : vector<16xf32>
    %28 = vector.multi_reduction <add>, %27, %cst_9 [1] : vector<16x10xf32> to vector<16xf32>
    %29 = vector.shape_cast %28 : vector<16xf32> to vector<16x1xf32>
    %cst_10 = arith.constant dense<0.000000e+00> : vector<16xf32>
    %30 = vector.multi_reduction <add>, %12, %cst_10 [1] : vector<16x10xf32> to vector<16xf32>
    %31 = vector.shape_cast %30 : vector<16xf32> to vector<16x1xf32>
    %32 = arith.mulf %22, %31 : vector<16x1xf32>
    %33 = arith.addf %29, %32 : vector<16x1xf32>
    %34 = vector.shape_cast %33 : vector<16x1xf32> to vector<1x16x1xf32>
    %cst_11 = arith.constant dense<0.000000e+00> : vector<1xf32>
    %35 = vector.multi_reduction <add>, %34, %cst_11 [1, 2] : vector<1x16x1xf32> to vector<1xf32>
    %36 = vector.shape_cast %35 : vector<1xf32> to vector<1x1x1xf32>
    %37 = vector.extract %36[0, 0, 0] : f32 from vector<1x1x1xf32>
    %38 = vector.broadcast %37 : f32 to vector<1x1x128xf32>
    %c0_12 = arith.constant 0 : index
    %c0_13 = arith.constant 0 : index
    %c0_14 = arith.constant 0 : index
    %39 = vector.load %arg4[%c0_12, %c0_13, %c0_14] : memref<1x1x128xf32, #tpu.memory_space<vmem>>, vector<1x1x128xf32>
    tpu.vector_store %arg4[%c0_12, %c0_13, %c0_14], %38 {strides = array<i32>} : memref<1x1x128xf32, #tpu.memory_space<vmem>>, vector<1x1x128xf32>,
    return
  }
  func.func @transform_0(%arg0: i32) -> (i32, i32) {
    %c0_i32 = arith.constant 0 : i32
    %c0_i32_0 = arith.constant 0 : i32
    return %arg0, %c0_i32 : i32, i32
  }
  func.func @transform_1(%arg0: i32) -> (i32, i32) {
    %c0_i32 = arith.constant 0 : i32
    %c0_i32_0 = arith.constant 0 : i32
    %c0_i32_1 = arith.constant 0 : i32
    return %c0_i32, %c0_i32_0 : i32, i32
  }
  func.func @transform_2(%arg0: i32) -> (i32, i32) {
    %c0_i32 = arith.constant 0 : i32
    %c0_i32_0 = arith.constant 0 : i32
    return %arg0, %c0_i32 : i32, i32
  }
  func.func @transform_3(%arg0: i32) -> (i32, i32, i32) {
    %c0_i32 = arith.constant 0 : i32
    %c0_i32_0 = arith.constant 0 : i32
    %c0_i32_1 = arith.constant 0 : i32
    return %arg0, %c0_i32, %c0_i32_0 : i32, i32, i32
  }
}

</mosaic_0001>

<bundles_post_ra>
// kernel: tpu_custom_call.1
= control target key start
LH: loop header
LB: loop body
LE: loop exit
PB: predicated region body
PF: predicated region fallthrough
CT: control target
= control target key end

     0   :  { %8 = vsyncpa [#allocation3], 0  ;;  %s315_s0 = inlined_call_operand.hbm [shape: f32[12,10], index: 0, kind: input, shape index: {}]   ;;  %s316_s1 = inlined_call_operand.vmem [shape: f32[1,10], index: 1, kind: input, shape index: {}]   ;;  %s317_s2 = inlined_call_operand.hbm [shape: f32[12,10], index: 2, kind: input, shape index: {}]   ;;  %s318_s3 = inlined_call_operand.hbm [shape: f32[1,1,128], index: 3, kind: output, shape index: {}]  }
   0x1   :  { %9 = vsyncpa [#allocation6], 0 }
   0x2   :  { %10 = vsyncpa [#allocation4], 0  ;;  %s241_s12 = smov [#allocation2]   ;;  %s169_s16 = scalar_lea.hbm %s315_s0, 256 }
   0x3   :  { %s16_s13 = sshll.u32 %s241_s12, 4  ;;  %p170_p0 = scmp.ne.s32.totalorder %s315_s0, %s169_s16  ;;  %s17_s13 = int_to_ptr.vmem [resolvable:$true] %s16_s13 }
   0x4   :  { %p173_p1 = scmp.lt.u32.totalorder %s169_s16, %s315_s0 }
   0x6   :  { %p175_p2 = pnand %p173_p1, %p170_p0 }
   0x8   :  { %178 = shalt.err (!%p175_p2)
}
   0x9   :  { %s179_s21 = scalar_lea.vmem %s17_s13, 256  ;;  %p184_p4 = scmp.lt.s32.totalorder %s17_s13, %s17_s13 }
   0xa   :  { %p180_p3 = scmp.ne.s32.totalorder %s17_s13, %s179_s21  ;;  %p185_p5 = scmp.lt.s32.totalorder %s179_s21, %s179_s21 }
   0xc   :  { %p186_p6 = por %p185_p5, %p184_p4 }
   0xe   :  { %p187_p7 = pnand %p186_p6, %p180_p3 }
  0x10   :  { %190 = shalt.err (!%p187_p7)
}
  0x11   :  { %s242_s22 = smov 128   ;;  %s243_s23 = smov 8  }
  0x12   :  { %22 = dma.hbm_to_vmem [thread:$0]  %s315_s0, 256, %s17_s13, [#allocation3], %s242_s22, %s242_s22, %s243_s23  }
  0x13   :  { %s244_s26 = smov [#allocation5]   ;;  %s191_s30 = scalar_lea.hbm %s317_s2, 256 }
  0x14   :  { %s30_s27 = sshll.u32 %s244_s26, 4  ;;  %p192_p8 = scmp.ne.s32.totalorder %s317_s2, %s191_s30  ;;  %s31_s27 = int_to_ptr.vmem [resolvable:$true] %s30_s27 }
  0x15   :  { %p195_p9 = scmp.lt.u32.totalorder %s191_s30, %s317_s2 }
  0x17   :  { %p197_p10 = pnand %p195_p9, %p192_p8 }
  0x19   :  { %200 = shalt.err (!%p197_p10)
}
  0x1a   :  { %s201_s8 = scalar_lea.vmem %s31_s27, 256  ;;  %p206_p12 = scmp.lt.s32.totalorder %s31_s27, %s31_s27 }
  0x1b   :  { %p202_p11 = scmp.ne.s32.totalorder %s31_s27, %s201_s8  ;;  %p207_p13 = scmp.lt.s32.totalorder %s201_s8, %s201_s8 }
  0x1d   :  { %p208_p0 = por %p207_p13, %p206_p12 }
  0x1f   :  { %p209_p1 = pnand %p208_p0, %p202_p11 }
  0x21   :  { %212 = shalt.err (!%p209_p1)
}
  0x22   :  { %36 = dma.hbm_to_vmem [thread:$0]  %s317_s2, 256, %s31_s27, [#allocation6], %s242_s22, %s242_s22, %s243_s23  }
  0x23   :  { %235 = dma.done.wait [#allocation3], 256  }
  0x24   :  { %236 = vsyncadd [#allocation3], 4294967040 }
  0x25   :  { %237 = dma.done.wait [#allocation6], 256  }
  0x26   :  { %238 = vsyncadd [#allocation6], 4294967040  ;;  %v48_v0 = vlaneseq  ;;  %v43_v3 = vld [vmem:[#allocation2] sm:$0xff]  ;;  %vm69_vm1 = vcmask 80896   ;;  %v44_v5 = vld [vmem:[#allocation2 + $0x8] sm:$0xff]  ;;  %vm118_vm2 = vcmask 7168  }
  0x27   :  { %v149_v4 = vld [vmem:[%s316_s1] ss:$0 sm:$0xff]  ;;  %v46_v11 = vld [vmem:[#allocation5] sm:$0xff]  ;;  %v47_v14 = vld [vmem:[#allocation5 + $0x8] sm:$0xff]  ;;  %s245_s1 = smov [#allocation7]  }
  0x28   :  { %v49_v1 = vshrl.u32 %v48_v0, 7  ;;  %v67_v6 = vadd.f32 %v149_v4, %v43_v3  ;;  %v108_v12 = vsel %vm69_vm1, %v46_v11, 0.0  ;;  %v92_v13 = vmax.f32 %v46_v11, 1e-30  ;;  %s139_s2 = sshll.u32 %s245_s1, 4  ;;  %s140_s2 = int_to_ptr.vmem [resolvable:$true] %s139_s2 }
  0x29   :  { %s213_s13 = scalar_lea.vmem %s140_s2, 16  ;;  %s217_s14 = scalar_lea.vmem %s140_s2, 32 }
  0x2a   :  { %v50_v2 = vadd.s32 8, %v49_v1  ;;  %v70_v9 = vsel %vm69_vm1, %v67_v6, -inf  ;;  %157 = vlog2.f32 %v92_v13  ;;  %p214_p2 = scmp.ne.s32.totalorder %s140_s2, %s213_s13  ;;  %p218_p3 = scmp.lt.s32.totalorder %s140_s2, %s140_s2 }
  0x2b   :  { %71 = vmax.xlane.f32.xlu0 %v70_v9  ;;  %p219_p4 = scmp.lt.s32.totalorder %s217_s14, %s213_s13 }
  0x2c   :  { %vm56_vm0 = vcmp.lt.s32.totalorder %v50_v2, 12 }
  0x2d   :  { %v58_v7 = vsel %vm56_vm0, %v44_v5, 0.0  ;;  %v60_v16 = vsel %vm56_vm0, %v47_v14, 0.0  ;;  %p220_p5 = por %p219_p4, %p218_p3 }
  0x2e   :  { %v68_v8 = vadd.f32 %v149_v4, %v58_v7  ;;  %v93_v18 = vmax.f32 %v60_v16, 1e-30  ;;  %v111_v35 = vsel %vm69_vm1, %v60_v16, 0.0 }
  0x2f   :  { %p221_p6 = pnand %p220_p5, %p214_p2 }
  0x30   :  { %v73_v10 = vsel %vm69_vm1, %v68_v8, -inf  ;;  %159 = vlog2.f32 %v93_v18 }
  0x31   :  { %74 = vmax.xlane.f32.xlu0 %v73_v10 }
  0x34   :  { %v158_v15 = vpop.eup %157 }
  0x35   :  { %109 = vadd.xlane.f32.xlu0 %v108_v12  ;;  %v95_v17 = vmul.f32 0.6931472, %v158_v15 }
  0x3a   :  { %v160_v28 = vpop.eup %159 }
  0x3b   :  { %v97_v30 = vmul.f32 0.6931472, %v160_v28 }
  0xb8   :  { %v72_v19 = vpop.xlane.xlu0 %71 }
  0xb9   :  { %v76_v20 = vsub.f32 %v67_v6, %v72_v19 }
  0xbb   :  { %v78_v21 = vmul.f32 1.442695, %v76_v20  ;;  %v98_v22 = vsub.f32 %v95_v17, %v76_v20 }
  0xbd   :  { %161 = vpow2.f32 %v78_v21  ;;  %v100_v25 = vmul.f32 %v98_v22, %v46_v11 }
  0xbe   :  { %v75_v23 = vpop.xlane.xlu0 %74 }
  0xbf   :  { %v77_v24 = vsub.f32 %v68_v8, %v75_v23  ;;  %v102_v27 = vsel %vm69_vm1, %v100_v25, 0.0 }
  0xc0   :  { %103 = vadd.xlane.f32.xlu0 %v102_v27 }
  0xc1   :  { %v80_v26 = vmul.f32 1.442695, %v77_v24  ;;  %v99_v33 = vsub.f32 %v97_v30, %v77_v24 }
  0xc2   :  { %v110_v41 = vpop.xlane.xlu0 %109 }
  0xc3   :  { %163 = vpow2.f32 %v80_v26  ;;  %v101_v36 = vmul.f32 %v99_v33, %v60_v16 }
  0xc5   :  { %v105_v37 = vsel %vm69_vm1, %v101_v36, 0.0 }
  0xc7   :  { %v162_v29 = vpop.eup %161 }
  0xc8   :  { %v82_v31 = vsel %vm69_vm1, %v162_v29, 0.0 }
  0xc9   :  { %83 = vadd.xlane.f32.xlu1 %v82_v31 }
  0xcd   :  { %v164_v32 = vpop.eup %163 }
  0xce   :  { %v85_v34 = vsel %vm69_vm1, %v164_v32, 0.0 }
  0xcf   :  { %86 = vadd.xlane.f32.xlu1 %v85_v34 }
  0xd3   :  { %112 = vadd.xlane.f32.xlu1 %v111_v35 }
  0xd7   :  { %106 = vadd.xlane.f32.xlu1 %v105_v37 }
 0x14d   :  { %v104_v47 = vpop.xlane.xlu0 %103 }
 0x156   :  { %v84_v38 = vpop.xlane.xlu1 %83 }
 0x157   :  { %165 = vlog2.f32 %v84_v38 }
 0x15c   :  { %v87_v39 = vpop.xlane.xlu1 %86 }
 0x15d   :  { %167 = vlog2.f32 %v87_v39 }
 0x160   :  { %v113_v43 = vpop.xlane.xlu1 %112 }
 0x161   :  { %v166_v40 = vpop.eup %165 }
 0x162   :  { %v89_v42 = vmul.f32 0.6931472, %v166_v40 }
 0x164   :  { %v114_v44 = vmul.f32 %v110_v41, %v89_v42  ;;  %v107_v50 = vpop.xlane.xlu1 %106 }
 0x166   :  { %v116_v49 = vadd.f32 %v114_v44, %v104_v47 }
 0x167   :  { %v168_v45 = vpop.eup %167 }
 0x168   :  { %v91_v46 = vmul.f32 0.6931472, %v168_v45  ;;  %v119_v52 = vsel %vm118_vm2, %v116_v49, 0.0 }
 0x16a   :  { %v115_v48 = vmul.f32 %v113_v43, %v91_v46 }
 0x16c   :  { %v117_v51 = vadd.f32 %v115_v48, %v107_v50 }
 0x16e   :  { %v120_v53 = vsel %vm118_vm2, %v117_v51, 0.0 }
 0x16f   :  { %v121_v54 = vadd.f32 %v120_v53, %v119_v52 }
 0x171   :  { %122 = vadd.xlane.f32.xlu0 %v121_v54 }
 0x1fe   :  { %v123_v55 = vpop.xlane.xlu0 %122 }
 0x1ff   :  { %v124_v56 = vrot.slane %v123_v55, 4 }
 0x201   :  { %v125_v57 = vadd.f32 %v124_v56, %v123_v55 }
 0x203   :  { %v126_v58 = vrot.slane %v125_v57, 2 }
 0x205   :  { %v127_v59 = vadd.f32 %v126_v58, %v125_v57 }
 0x207   :  { %v128_v60 = vrot.slane %v127_v59, 1 }
 0x209   :  { %v129_v61 = vadd.f32 %v128_v60, %v127_v59 }
 0x20b   :  { %150 = vpush %v129_v61 }
 0x23c   :  { %s151_s12 = spop %150 }
 0x23d   :  { %v131_v62 = vstv %s151_s12 }
 0x23e   :  { %132 = vst [vmem:[#allocation7] sm:$0x1] %v131_v62 }
 0x23f   :  { %224 = shalt.err (!%p221_p6)
}
 0x240   :  { %s225_s17 = scalar_lea.hbm %s318_s3, 16 }
 0x241   :  { %p226_p7 = scmp.ne.s32.totalorder %s318_s3, %s225_s17  ;;  %p229_p8 = scmp.lt.u32.totalorder %s225_s17, %s318_s3 }
 0x243   :  { %p231_p9 = pnand %p229_p8, %p226_p7 }
 0x245   :  { %234 = shalt.err (!%p231_p9)
}
 0x246   :  { %142 = dma.vmem_to_hbm [thread:$0]  %s140_s2, 16, %s318_s3, [#allocation4]  }
 0x247   :  { %239 = dma.done.wait [#allocation4], 16  }
 0x248   :  { %240 = vsyncadd [#allocation4], 4294967280 }
 0x249   :  { %146 = vsyncpa [#allocation3], 1 }
 0x24a   :  { %147 = vsyncpa [#allocation6], 1 }
 0x24b   :  { %148 = vsyncpa [#allocation4], 1 }

</bundles_post_ra>
